<compile_context>
chip_gen: v5e
topology: v5e:2x2
jax: 0.10.0
libtpu: 0.0.40
codegen_flags: <defaults>
</compile_context>

<pallas_src>
import functools

import jax
import jax.numpy as jnp
from jax import lax
from jax.experimental import pallas as pl
from jax.experimental.pallas import tpu as pltpu


# 48 MiB scoped limit: above v5e/v6e defaults (16/32 MiB), below v7x's 64 MiB
# physical VMEM. Tiles are budgeted against 40 MiB to leave compiler headroom.
_VMEM_LIMIT_BYTES = 48 << 20
_VMEM_TILE_BUDGET_BYTES = 40 << 20


def _round_down(x, m):
    return (x // m) * m


def _round_up(x, m):
    return ((x + m - 1) // m) * m


def _pick_row_tile(rows, H, C, x_itemsize, out_itemsize, *,
                   tm_cap=4096, tile_budget_bytes=_VMEM_TILE_BUDGET_BYTES):
    """Pick the row tile TM.

    Budget-aware: TM is the largest multiple of 128 (capped at tm_cap) such
    that the double-buffered x tile, double-buffered (C, TM) output tile and
    the resident (C, H) weight block fit in the VMEM tile budget.

    BlockSpec (8, 128) rule:
      * x block (TM, H): TM is second-to-last -> multiple of 8 or == rows.
      * out block (C, TM): TM is last -> multiple of 128 or == rows.
    Both are satisfied since TM is either a multiple of 128 or equals rows.
    """
    c_pad = _round_up(max(C, 1), 8)
    # tm-independent residents (conservatively assume double-buffered anyway).
    w_bytes = 2 * c_pad * _round_up(H, 128) * x_itemsize
    b_bytes = 2 * 8 * 128 * 4
    budget = max(tile_budget_bytes - w_bytes - b_bytes, 1 << 20)
    # Per-row VMEM cost: 2x x tile + 2x output tile.
    per_row = 2 * H * x_itemsize + 2 * c_pad * out_itemsize
    tm = min(tm_cap, _round_down(max(budget // per_row, 128), 128))
    tm = max(tm, 128)

    if rows <= tm:
        if rows >= 256:
            # Split into >= 2 lane-dense (multiple-of-128) tiles so both v7x
            # TensorCores get work; cheap on single-TC v5e/v6e.
            tm = max(128, _round_down(rows // 2, 128))
        else:
            tm = rows  # single full-extent block
    return tm


def _value_head_kernel(x_ref, w_ref, b_ref, o_ref, *, use_tanh):
    # x_ref: (TM, H), w_ref: (C, H), b_ref: (C, 1), o_ref: (C, TM)
    # Contract H of (C, H) with H of (TM, H) -> (C, TM): lane-dense along TM.
    y = lax.dot_general(
        w_ref[...], x_ref[...],
        dimension_numbers=(((1,), (1,)), ((), ())),
        preferred_element_type=jnp.float32,
    )
    y = y + b_ref[...]          # (C, 1) broadcasts across the TM lanes
    if use_tanh:
        y = jnp.tanh(y)
    o_ref[...] = y.astype(o_ref.dtype)


def value_head_forward(hidden_states, weight, bias, *,
                       summary_activation_tanh=False, use_bf16_inputs=False):
    """Pallas implementation of ValueHead.forward (eval mode).

    hidden_states: (B, S, H) float32
    weight:        (C, H)    torch nn.Linear layout (num_labels, hidden_size)
    bias:          (C,)
    returns:       (B, S, C) in hidden_states.dtype
    """
    B, S, H = hidden_states.shape
    C = weight.shape[0]
    rows = B * S
    out_dtype = hidden_states.dtype

    x2d = hidden_states.reshape(rows, H)
    w2d = weight
    if use_bf16_inputs:
        # Halves HBM read traffic (the dominant cost); accumulation stays f32.
        x2d = x2d.astype(jnp.bfloat16)
        w2d = w2d.astype(jnp.bfloat16)
    b2d = bias.astype(jnp.float32).reshape(C, 1)

    x_itemsize = jnp.dtype(x2d.dtype).itemsize
    out_itemsize = jnp.dtype(out_dtype).itemsize

    tm = _pick_row_tile(rows, H, C, x_itemsize, out_itemsize)
    grid = (pl.cdiv(rows, tm),)

    kernel = functools.partial(_value_head_kernel,
                               use_tanh=summary_activation_tanh)

    cost = pl.CostEstimate(
        flops=2 * rows * H * C,
        transcendentals=rows * C if summary_activation_tanh else 0,
        bytes_accessed=(rows * H * x_itemsize
                        + C * H * x_itemsize
                        + C * 4
                        + rows * C * out_itemsize),
    )

    out_cr = pl.pallas_call(
        kernel,
        out_shape=jax.ShapeDtypeStruct((C, rows), out_dtype),
        grid=grid,
        in_specs=[
            # x: tiled along rows — pipelined HBM->VMEM DMA per grid step.
            pl.BlockSpec((tm, H), lambda i: (i, 0)),
            # weight / bias: constant block index -> resident across the grid.
            pl.BlockSpec((C, H), lambda i: (0, 0)),
            pl.BlockSpec((C, 1), lambda i: (0, 0)),
        ],
        # Lane-dense output: unmasked 128-lane stores per tile.
        out_specs=pl.BlockSpec((C, tm), lambda i: (0, i)),
        compiler_params=pltpu.CompilerParams(
            dimension_semantics=("parallel",),
            vmem_limit_bytes=_VMEM_LIMIT_BYTES,
        ),
        cost_estimate=cost,
    )(x2d, w2d, b2d)

    # (C, rows) -> (rows, C) -> (B, S, C); tiny array, negligible cost.
    return out_cr.T.reshape(B, S, C)


if __name__ == "__main__":
    # Config implied by the module: summary_use_proj=True,
    # summary_proj_to_labels=True, num_labels=1 (scalar value per token),
    # dropouts in eval mode.
    B, S, H = 2, 8, 32
    NUM_LABELS = 1

    key = jax.random.PRNGKey(0)
    k_x, k_w, k_b = jax.random.split(key, 3)

    hidden_states = jax.random.normal(k_x, (B, S, H), dtype=jnp.float32)

    # Deterministic init matching nn.Linear's default: U(-1/sqrt(H), 1/sqrt(H)).
    bound = 1.0 / (H ** 0.5)
    weight = jax.random.uniform(k_w, (NUM_LABELS, H), jnp.float32, -bound, bound)
    bias = jax.random.uniform(k_b, (NUM_LABELS,), jnp.float32, -bound, bound)

    ref = hidden_states @ weight.T + bias  # (B, S, C)

    # summary_activation=None (Identity) path.
    out = value_head_forward(hidden_states, weight, bias,
                             summary_activation_tanh=False)
    out = jax.block_until_ready(out)
    assert out.shape == (B, S, NUM_LABELS), out.shape
    assert jnp.allclose(out, ref, atol=1e-5, rtol=1e-5), \
        "mismatch vs reference (identity)"

    # summary_activation='tanh' path.
    out_t = value_head_forward(hidden_states, weight, bias,
                               summary_activation_tanh=True)
    out_t = jax.block_until_ready(out_t)
    assert jnp.allclose(out_t, jnp.tanh(ref), atol=1e-5, rtol=1e-5), \
        "mismatch vs reference (tanh)"

    # Opt-in bf16 input path (input rounding only; f32 accumulation).
    out_bf = value_head_forward(hidden_states, weight, bias,
                                summary_activation_tanh=True,
                                use_bf16_inputs=True)
    out_bf = jax.block_until_ready(out_bf)
    assert jnp.allclose(out_bf, jnp.tanh(ref), atol=5e-2, rtol=5e-2), \
        "mismatch vs reference (bf16 path)"

    print("KERNEL_OK")
</pallas_src>

<mosaic_0001>
module attributes {stable_mosaic.version = 11 : i64} {
  func.func @_value_head_kernel(%arg0: i32, %arg1: memref<16x32xf32, #tpu.memory_space<vmem>>, %arg2: memref<1x32xf32, #tpu.memory_space<vmem>>, %arg3: memref<1x1xf32, #tpu.memory_space<vmem>>, %arg4: memref<1x16xf32, #tpu.memory_space<vmem>>) attributes {dimension_semantics = [#tpu.dimension_semantics<parallel>], iteration_bounds = array<i64: 1>, scalar_prefetch = 0 : i64, scratch_operands = 0 : i64, tpu.core_type = #tpu.core_type<tc>, window_params = [{transform_indices = @transform_0, window_bounds = array<i64: 16, 32>}, {pipeline_mode = #tpu.pipeline_mode<synchronous>, transform_indices = @transform_1, window_bounds = array<i64: 1, 32>}, {pipeline_mode = #tpu.pipeline_mode<synchronous>, transform_indices = @transform_2, window_bounds = array<i64: 1, 1>}, {transform_indices = @transform_3, window_bounds = array<i64: 1, 16>}]} {
    %c0 = arith.constant 0 : index
    %c0_0 = arith.constant 0 : index
    %0 = vector.load %arg2[%c0, %c0_0] : memref<1x32xf32, #tpu.memory_space<vmem>>, vector<1x32xf32>
    %c0_1 = arith.constant 0 : index
    %c0_2 = arith.constant 0 : index
    %1 = vector.load %arg1[%c0_1, %c0_2] : memref<16x32xf32, #tpu.memory_space<vmem>>, vector<16x32xf32>
    %cst = arith.constant dense<0.000000e+00> : vector<1x16xf32>
    %2 = tpu.matmul %0, %1, %cst {dimension_numbers = #tpu.dot_dimension_numbers<[1], [1], [0], [0], [0, 0, 1, 0], [], []>} : vector<1x32xf32>, vector<16x32xf32>, vector<1x16xf32> -> vector<1x16xf32>
    %c0_3 = arith.constant 0 : index
    %c0_4 = arith.constant 0 : index
    %3 = vector.load %arg3[%c0_3, %c0_4] : memref<1x1xf32, #tpu.memory_space<vmem>>, vector<1x1xf32>
    %4 = vector.broadcast %3 : vector<1x1xf32> to vector<1x16xf32>
    %5 = arith.addf %2, %4 : vector<1x16xf32>
    %c0_5 = arith.constant 0 : index
    %c0_6 = arith.constant 0 : index
    %6 = vector.load %arg4[%c0_5, %c0_6] : memref<1x16xf32, #tpu.memory_space<vmem>>, vector<1x16xf32>
    tpu.vector_store %arg4[%c0_5, %c0_6], %5 {strides = array<i32>} : memref<1x16xf32, #tpu.memory_space<vmem>>, vector<1x16xf32>,
    return
  }
  func.func @transform_0(%arg0: i32) -> (i32, i32) {
    %c0_i32 = arith.constant 0 : i32
    %c0_i32_0 = arith.constant 0 : i32
    return %arg0, %c0_i32 : i32, i32
  }
  func.func @transform_1(%arg0: i32) -> (i32, i32) {
    %c0_i32 = arith.constant 0 : i32
    %c0_i32_0 = arith.constant 0 : i32
    %c0_i32_1 = arith.constant 0 : i32
    return %c0_i32, %c0_i32_0 : i32, i32
  }
  func.func @transform_2(%arg0: i32) -> (i32, i32) {
    %c0_i32 = arith.constant 0 : i32
    %c0_i32_0 = arith.constant 0 : i32
    %c0_i32_1 = arith.constant 0 : i32
    return %c0_i32, %c0_i32_0 : i32, i32
  }
  func.func @transform_3(%arg0: i32) -> (i32, i32) {
    %c0_i32 = arith.constant 0 : i32
    %c0_i32_0 = arith.constant 0 : i32
    return %c0_i32, %arg0 : i32, i32
  }
}

</mosaic_0001>

<bundles_post_ra>
// kernel: tpu_custom_call.1
= control target key start
LH: loop header
LB: loop body
LE: loop exit
PB: predicated region body
PF: predicated region fallthrough
CT: control target
= control target key end

     0   :  { %s190_s0 = inlined_call_operand.hbm [shape: f32[16,32], index: 0, kind: input, shape index: {}]   ;;  %s191_s1 = inlined_call_operand.vmem [shape: f32[1,32], index: 1, kind: input, shape index: {}]   ;;  %s192_s2 = inlined_call_operand.<no memory space> [shape: f32[1,1], index: 2, kind: input, shape index: {}]   ;;  %s193_s3 = inlined_call_operand.hbm [shape: f32[1,16], index: 3, kind: output, shape index: {}]  }
   0x1   :  { %v8_v0 = vstv %s192_s2 }
   0x2   :  { %9 = vst [vmem:[#allocation2] sm:$0x1] %v8_v0 }
   0x3   :  { %10 = vsyncpa [#allocation4], 0 }
   0x4   :  { %11 = vsyncpa [#allocation5], 0  ;;  %s16_s16 = sshll.u32 %s190_s0, 4  ;;  %s153_s17 = smov [#allocation3]   ;;  %s17_s16 = int_to_ptr.hbm [resolvable:$true] %s16_s16 }
   0x5   :  { %s18_s18 = sshll.u32 %s153_s17, 4  ;;  %s154_s19 = smov 128   ;;  %s19_s18 = int_to_ptr.vmem [resolvable:$true] %s18_s18 }
   0x6   :  { %s155_s20 = smov 8  }
   0x7   :  { %24 = dma.hbm_to_vmem [thread:$0]  %s17_s16, 256, %s19_s18, [#allocation4], %s154_s19, %s154_s19, %s155_s20  }
   0x8   :  { %149 = dma.done.wait [#allocation4], 256  }
   0x9   :  { %150 = vsyncadd [#allocation4], 4294967040  ;;  %v156_v1 = vmov 0   ;;  %vm43_vm0 = vcmask 261120   ;;  %v35_v2 = vld [vmem:[#allocation3 + $0x8] sm:$0xff]  ;;  %v34_v4 = vld [vmem:[#allocation3] sm:$0xff] }
   0xa   :  { %100 = vset.pattern.permute.xlu0 %v156_v1  ;;  %92 = vmatpush.xpose.msk.msra.mxu0 %vm43_vm0, %v35_v2  ;;  %v36_v3 = vld [vmem:[#allocation2] sm:$0x1]  ;;  %s157_s21 = smov [#allocation6]   ;;  %s82_s25 = sshll.u32 %s193_s3, 4  ;;  %vm73_vm1 = vcmask 122880   ;;  %s83_s25 = int_to_ptr.hbm [resolvable:$true] %s82_s25 }
   0xb   :  { %39 = vperm.xlu0 %100, %v36_v3   ;;  %v33_v5 = vld [vmem:[%s191_s1] sm:$0x1]  ;;  %s80_s22 = sshll.u32 %s157_s21, 4  ;;  %s81_s22 = int_to_ptr.vmem [resolvable:$true] %s80_s22 }
   0xe   :  { %93 = vmatpush.xpose.msk.msra.mxu0 %vm43_vm0, %v34_v4 }
  0x11   :  { %94 = vmatmul.msk.f32.vlgmr.msra.gmra.mxu0 %vm43_vm0, %v33_v5 }
  0x7d   :  { %v40_v6 = vpop.permute.xlu0 %39 }
  0x7e   :  { %v42_v7 = vperm.slane %v40_v6, 0 }
  0x8e   :  { %v70_v8 = vpop.f32.mrf.mxu0 }
  0x8f   :  { %v71_v9 = vadd.f32 %v70_v8, %v42_v7 }
  0x91   :  { %74 = vst.msk [vmem:[#allocation6] sm:$0x1] %vm73_vm1, %v71_v9 }
  0x92   :  { %85 = dma.vmem_to_hbm [thread:$0]  %s81_s22, 16, %s83_s25, [#allocation5]  }
  0x93   :  { %151 = dma.done.wait [#allocation5], 16  }
  0x94   :  { %152 = vsyncadd [#allocation5], 4294967280 }
  0x95   :  { %90 = vsyncpa [#allocation4], 1 }
  0x96   :  { %91 = vsyncpa [#allocation5], 1 }

</bundles_post_ra>
